<compile_context>
chip_gen: v7x
topology: tpu7x:2x2x1
jax: 0.10.0
libtpu: 0.0.40
codegen_flags: <defaults>
</compile_context>

<pallas_src>
import functools

import jax
import jax.numpy as jnp
from jax import lax
from jax.experimental import pallas as pl
from jax.experimental.pallas import tpu as pltpu

NEG = -1.0e30


def _round_up(x, m):
    return (x + m - 1) // m * m


def _graph_loss_kernel(tilemax_ref, emit_ref, lens_ref, onehot_ref,
                       exp_trans_ref, shift_ref, start_ref, final_ref,
                       out_ref, se_ref, alpha_ref, *, output_beam, t_tile):
    """One grid step == TB sequences x T_tile frames.

    tilemax_ref:   (num_b_tiles,) int32 SMEM -- max seq len per batch tile
    emit_ref:      (T_tile, TB, C)          -- this chunk's log-probs
    lens_ref:      (TB, 1) int32            -- per-sequence valid frame counts
    onehot_ref:    (C, S_pad)               -- label -> state one-hot
    exp_trans_ref: (S_pad, S_pad)           -- exp(trans - col_shift), 0 == no arc
    shift_ref:     (1, S_pad)               -- per-destination-column shift
    start_ref:     (1, S_pad)               -- log start scores
    final_ref:     (1, S_pad)               -- log final scores
    out_ref:       (TB, 1)                  -- total log scores for this tile
    se_ref:        (T_tile, TB, S_pad) VMEM -- per-frame state emission scores
    alpha_ref:     (TB, S_pad) VMEM         -- forward scores, carried over chunks
    """
    b = pl.program_id(0)
    tc = pl.program_id(1)
    n_tc = pl.num_programs(1)

    TB, S = alpha_ref.shape
    C = emit_ref.shape[-1]

    # Per-state emission scores for the whole chunk: one big MXU matmul.
    emit = emit_ref[...].reshape(t_tile * TB, C)
    se = jnp.dot(emit, onehot_ref[...], preferred_element_type=jnp.float32)
    se_ref[...] = se.reshape(t_tile, TB, S)

    # Chunk 0: alpha = start + frame-0 emissions.
    @pl.when(tc == 0)
    def _():
        alpha_ref[...] = start_ref[...] + se_ref[0]

    lens_row = lens_ref[...]                   # (TB, 1) int32
    shift = shift_ref[...]                     # (1, S)
    exp_trans = exp_trans_ref[...]             # (S, S)
    chunk_start = tc * t_tile

    # Skip frames past this tile's longest sequence.
    lo = jnp.where(tc == 0, 1, 0).astype(jnp.int32)
    hi = jnp.clip(tilemax_ref[b] - chunk_start, 0, t_tile)

    alpha = alpha_ref[...]                                   # (TB, S)
    m = jnp.max(alpha, axis=-1, keepdims=True)               # (TB, 1)

    def step(t, carry):
        alpha, m = carry
        # logsumexp_i(alpha[i] + trans[i, j]) via the exp-matmul trick.
        p = jnp.exp(alpha - m)                               # (TB, S)  EUP
        s = jnp.dot(p, exp_trans,
                    preferred_element_type=jnp.float32)      # (TB, S)  MXU
        trans_lse = jnp.where(s > 0.0,
                              jnp.log(jnp.maximum(s, 1e-37)) + shift,
                              NEG)
        new_alpha = se_ref[t] + m + trans_lse                # (TB, S)

        # Frame-level beam pruning (approximation of intersect_dense's
        # output_beam).  The max survives pruning, so it doubles as the next
        # step's logsumexp shift -> only one cross-lane max per step.
        mx = jnp.max(new_alpha, axis=-1, keepdims=True)
        new_alpha = jnp.where(new_alpha >= mx - output_beam, new_alpha, NEG)

        # Sequences shorter than this frame keep their previous state.
        active = (chunk_start + t) < lens_row                # (TB, 1)
        return (jnp.where(active, new_alpha, alpha),
                jnp.where(active, mx, m))

    alpha, _ = lax.fori_loop(lo, hi, step, (alpha, m))
    alpha_ref[...] = alpha

    # Last chunk: total score = logsumexp over final states.
    @pl.when(tc == n_tc - 1)
    def _():
        v = alpha_ref[...] + final_ref[...]
        mf = jnp.max(v, axis=-1, keepdims=True)
        out_ref[...] = mf + jnp.log(
            jnp.sum(jnp.exp(v - mf), axis=-1, keepdims=True))


def graph_loss(emissions, seq_lens, label_onehot, trans, start, final,
               *, output_beam, reduction="sum", target_lengths=None,
               batch_tile=8, time_tile=None):
    """Pallas implementation of GraphLoss.forward (use_double_scores=False)."""
    assert reduction in ("none", "mean", "sum")
    B, T, C = emissions.shape
    S = trans.shape[0]

    TB = max(8, _round_up(batch_tile, 8))          # sublane-full batch tile
    S_pad = _round_up(S, 128)                      # lane-dense state dim
    B_pad = _round_up(B, TB)

    if time_tile is None:
        # Keep double-buffered emissions + state_emit scratch well under the
        # v7x 64 MiB VMEM ceiling (also fine for v5e/v6e's 128 MiB).
        budget = 24 * 1024 * 1024
        per_frame = TB * 4 * (2 * C + S_pad)
        tt = max(8, min(128, budget // max(per_frame, 1)))
        time_tile = min((tt // 8) * 8, _round_up(T, 8))
    T_tile = max(8, _round_up(time_tile, 8))
    T_pad = _round_up(T, T_tile)

    num_b = B_pad // TB
    num_tc = T_pad // T_tile

    f32 = jnp.float32
    # Pad batch/time; transpose so the kernel block is (T_tile, TB, C) and the
    # per-frame read inside the recurrence is a cheap leading-dim load.
    em = jnp.pad(emissions.astype(f32),
                 ((0, B_pad - B), (0, T_pad - T), (0, 0)))
    em_t = jnp.transpose(em, (1, 0, 2))                        # (T_pad, B_pad, C)

    lens_p = jnp.pad(seq_lens.astype(jnp.int32), (0, B_pad - B))
    tile_max = jnp.max(lens_p.reshape(num_b, TB), axis=1)      # (num_b,) -> SMEM
    lens_2d = lens_p.reshape(B_pad, 1)

    # Pad states; padded arcs/states are dead (0 in exp space, NEG in log space).
    onehot_p = jnp.pad(label_onehot.astype(f32), ((0, 0), (0, S_pad - S)))
    trans_p = jnp.pad(trans.astype(f32),
                      ((0, S_pad - S), (0, S_pad - S)), constant_values=NEG)
    col_max = jnp.max(trans_p, axis=0, keepdims=True)
    shift = jnp.where(col_max > 0.5 * NEG, col_max, 0.0)       # (1, S_pad)
    exp_trans = jnp.exp(trans_p - shift)                       # in [0, 1]
    start_p = jnp.pad(start.astype(f32), ((0, 0), (0, S_pad - S)),
                      constant_values=NEG)
    final_p = jnp.pad(final.astype(f32), ((0, 0), (0, S_pad - S)),
                      constant_values=NEG)

    # VMEM estimate: double-buffered inputs + scratch + headroom.
    est = 4 * (2 * T_tile * TB * C + 2 * TB
               + 2 * (C * S_pad + S_pad * S_pad + 3 * S_pad)
               + T_tile * TB * S_pad + TB * S_pad + 2 * TB)
    vmem_limit = int(min(max(est + (8 << 20), 32 << 20), 64 << 20))

    kernel = functools.partial(_graph_loss_kernel,
                               output_beam=float(output_beam),
                               t_tile=T_tile)

    tot = pl.pallas_call(
        kernel,
        out_shape=jax.ShapeDtypeStruct((B_pad, 1), jnp.float32),
        grid_spec=pltpu.PrefetchScalarGridSpec(
            num_scalar_prefetch=1,                 # per-tile max seq lens
            grid=(num_b, num_tc),
            in_specs=[
                pl.BlockSpec((T_tile, TB, C), lambda b, t, tm: (t, b, 0)),
                pl.BlockSpec((TB, 1), lambda b, t, tm: (b, 0)),
                # TODO(synk): pipeline_mode=pl.Buffered(1) on these four
                # grid-invariant graph operands would halve their VMEM use.
                pl.BlockSpec((C, S_pad), lambda b, t, tm: (0, 0)),
                pl.BlockSpec((S_pad, S_pad), lambda b, t, tm: (0, 0)),
                pl.BlockSpec((1, S_pad), lambda b, t, tm: (0, 0)),
                pl.BlockSpec((1, S_pad), lambda b, t, tm: (0, 0)),
                pl.BlockSpec((1, S_pad), lambda b, t, tm: (0, 0)),
            ],
            out_specs=pl.BlockSpec((TB, 1), lambda b, t, tm: (b, 0)),
            scratch_shapes=[
                pltpu.VMEM((T_tile, TB, S_pad), jnp.float32),  # state emissions
                pltpu.VMEM((TB, S_pad), jnp.float32),          # alpha carry
            ],
        ),
        compiler_params=pltpu.CompilerParams(
            dimension_semantics=("parallel", "arbitrary"),
            vmem_limit_bytes=vmem_limit),
    )(tile_max, em_t, lens_2d, onehot_p, exp_trans, shift, start_p, final_p)

    tot_scores = tot[:B, 0]
    loss = (-1.0 * tot_scores).astype(jnp.float32)
    if reduction == "none":
        return loss
    elif reduction == "sum":
        return loss.sum()
    else:  # mean
        loss = loss / target_lengths
        return loss.mean()


def _reference_graph_loss(emissions, seq_lens, label_onehot, trans, start,
                          final, output_beam):
    """Pure-JAX forward recursion mirroring the kernel math (for checking)."""
    B, T, _ = emissions.shape
    state_emit = jnp.einsum("btc,cs->bts", emissions, label_onehot)
    tots = []
    for b in range(B):
        alpha = start[0] + state_emit[b, 0]

        def step(t, alpha, b=b):
            x = alpha[:, None] + trans
            lse = jax.scipy.special.logsumexp(x, axis=0)
            new_alpha = state_emit[b, t] + lse
            mx = jnp.max(new_alpha)
            new_alpha = jnp.where(new_alpha >= mx - output_beam, new_alpha, NEG)
            return jnp.where(t < seq_lens[b], new_alpha, alpha)

        alpha = lax.fori_loop(1, T, step, alpha)
        tots.append(jax.scipy.special.logsumexp(alpha + final[0]))
    return -jnp.stack(tots)


if __name__ == "__main__":
    B, T, C, S = 2, 8, 16, 8
    key = jax.random.PRNGKey(0)

    # Neural-network output -> dense FSA vector (log-probs).
    logits = jax.random.normal(key, (B, T, C), dtype=jnp.float32)
    emissions = jax.nn.log_softmax(logits, axis=-1)
    seq_lens = jnp.array([T, T - 2], dtype=jnp.int32)

    # Deterministic synthetic decoding graph: left-to-right chain with
    # self-loops; state j emits class (j % C); every state is final.
    labels = jnp.arange(S) % C
    label_onehot = jax.nn.one_hot(labels, C, dtype=jnp.float32).T    # (C, S)

    trans = jnp.full((S, S), NEG, dtype=jnp.float32)
    trans = trans.at[jnp.arange(S), jnp.arange(S)].set(jnp.log(0.6))         # self-loops
    trans = trans.at[jnp.arange(S - 1), jnp.arange(1, S)].set(jnp.log(0.4))  # forward arcs

    start = jnp.full((1, S), NEG, dtype=jnp.float32).at[0, 0].set(0.0)
    final = jnp.zeros((1, S), dtype=jnp.float32)

    target_lengths = jnp.array([5.0, 4.0], dtype=jnp.float32)

    loss_sum = graph_loss(emissions, seq_lens, label_onehot, trans, start, final,
                          output_beam=10.0, reduction="sum")
    loss_none = graph_loss(emissions, seq_lens, label_onehot, trans, start, final,
                           output_beam=10.0, reduction="none")
    loss_mean = graph_loss(emissions, seq_lens, label_onehot, trans, start, final,
                           output_beam=10.0, reduction="mean",
                           target_lengths=target_lengths)
    jax.block_until_ready((loss_sum, loss_none, loss_mean))

    assert loss_none.shape == (B,) and loss_sum.shape == () and loss_mean.shape == ()
    assert bool(jnp.isfinite(loss_sum)) and bool(jnp.all(jnp.isfinite(loss_none)))

    # Sanity-check against a pure-JAX forward recursion (loose tolerance:
    # the kernel uses the exp-matmul logsumexp trick at MXU precision).
    ref = _reference_graph_loss(emissions, seq_lens, label_onehot, trans,
                                start, final, 10.0)
    assert bool(jnp.allclose(loss_none, ref, rtol=5e-2, atol=5e-2)), (loss_none, ref)

    print("KERNEL_OK")
</pallas_src>

<mosaic_0001>
module attributes {stable_mosaic.version = 11 : i64} {
  func.func @_graph_loss_kernel(%arg0: i32, %arg1: i32, %arg2: memref<1xi32, #tpu.memory_space<smem>>, %arg3: memref<8x8x16xf32, #tpu.memory_space<vmem>>, %arg4: memref<8x1xi32, #tpu.memory_space<vmem>>, %arg5: memref<16x128xf32, #tpu.memory_space<vmem>>, %arg6: memref<128x128xf32, #tpu.memory_space<vmem>>, %arg7: memref<1x128xf32, #tpu.memory_space<vmem>>, %arg8: memref<1x128xf32, #tpu.memory_space<vmem>>, %arg9: memref<1x128xf32, #tpu.memory_space<vmem>>, %arg10: memref<8x1xf32, #tpu.memory_space<vmem>>, %arg11: memref<8x8x128xf32, #tpu.memory_space<vmem>>, %arg12: memref<8x128xf32, #tpu.memory_space<vmem>>) attributes {dimension_semantics = [#tpu.dimension_semantics<parallel>, #tpu.dimension_semantics<arbitrary>], iteration_bounds = array<i64: 1, 1>, scalar_prefetch = 1 : i64, scratch_operands = 2 : i64, tpu.core_type = #tpu.core_type<tc>, window_params = [{transform_indices = @transform_0, window_bounds = array<i64: 8, 8, 16>}, {transform_indices = @transform_1, window_bounds = array<i64: 8, 1>}, {pipeline_mode = #tpu.pipeline_mode<synchronous>, transform_indices = @transform_2, window_bounds = array<i64: 16, 128>}, {pipeline_mode = #tpu.pipeline_mode<synchronous>, transform_indices = @transform_3, window_bounds = array<i64: 128, 128>}, {pipeline_mode = #tpu.pipeline_mode<synchronous>, transform_indices = @transform_4, window_bounds = array<i64: 1, 128>}, {pipeline_mode = #tpu.pipeline_mode<synchronous>, transform_indices = @transform_5, window_bounds = array<i64: 1, 128>}, {pipeline_mode = #tpu.pipeline_mode<synchronous>, transform_indices = @transform_6, window_bounds = array<i64: 1, 128>}, {transform_indices = @transform_7, window_bounds = array<i64: 8, 1>}]} {
    %c0 = arith.constant 0 : index
    %c0_0 = arith.constant 0 : index
    %c0_1 = arith.constant 0 : index
    %0 = vector.load %arg3[%c0, %c0_0, %c0_1] : memref<8x8x16xf32, #tpu.memory_space<vmem>>, vector<8x8x16xf32>
    %1 = vector.shape_cast %0 : vector<8x8x16xf32> to vector<64x16xf32>
    %c0_2 = arith.constant 0 : index
    %c0_3 = arith.constant 0 : index
    %2 = vector.load %arg5[%c0_2, %c0_3] : memref<16x128xf32, #tpu.memory_space<vmem>>, vector<16x128xf32>
    %cst = arith.constant dense<0.000000e+00> : vector<64x128xf32>
    %3 = tpu.matmul %1, %2, %cst {dimension_numbers = #tpu.dot_dimension_numbers<[1], [0], [0], [1], [0, 0, 1, 1], [], []>} : vector<64x16xf32>, vector<16x128xf32>, vector<64x128xf32> -> vector<64x128xf32>
    %4 = vector.shape_cast %3 : vector<64x128xf32> to vector<8x8x128xf32>
    %c0_4 = arith.constant 0 : index
    %c0_5 = arith.constant 0 : index
    %c0_6 = arith.constant 0 : index
    %5 = vector.load %arg11[%c0_4, %c0_5, %c0_6] : memref<8x8x128xf32, #tpu.memory_space<vmem>>, vector<8x8x128xf32>
    tpu.vector_store %arg11[%c0_4, %c0_5, %c0_6], %4 {strides = array<i32>} : memref<8x8x128xf32, #tpu.memory_space<vmem>>, vector<8x8x128xf32>,
    %c0_i32 = arith.constant 0 : i32
    %6 = arith.cmpi eq, %arg1, %c0_i32 : i32
    %7 = arith.extui %6 : i1 to i32
    %c0_i32_7 = arith.constant 0 : i32
    %8 = arith.cmpi ne, %7, %c0_i32_7 : i32
    scf.if %8 {
      %c0_26 = arith.constant 0 : index
      %c0_27 = arith.constant 0 : index
      %30 = vector.load %arg8[%c0_26, %c0_27] : memref<1x128xf32, #tpu.memory_space<vmem>>, vector<1x128xf32>
      %c0_28 = arith.constant 0 : index
      %c0_29 = arith.constant 0 : index
      %c0_30 = arith.constant 0 : index
      %31 = vector.load %arg11[%c0_28, %c0_29, %c0_30] : memref<8x8x128xf32, #tpu.memory_space<vmem>>, vector<1x8x128xf32>
      %32 = vector.shape_cast %31 : vector<1x8x128xf32> to vector<8x128xf32>
      %33 = vector.broadcast %30 : vector<1x128xf32> to vector<8x128xf32>
      %34 = arith.addf %33, %32 : vector<8x128xf32>
      %c0_31 = arith.constant 0 : index
      %c0_32 = arith.constant 0 : index
      %35 = vector.load %arg12[%c0_31, %c0_32] : memref<8x128xf32, #tpu.memory_space<vmem>>, vector<8x128xf32>
      tpu.vector_store %arg12[%c0_31, %c0_32], %34 {strides = array<i32>} : memref<8x128xf32, #tpu.memory_space<vmem>>, vector<8x128xf32>,
    } else {
    }
    %c0_8 = arith.constant 0 : index
    %c0_9 = arith.constant 0 : index
    %9 = vector.load %arg4[%c0_8, %c0_9] : memref<8x1xi32, #tpu.memory_space<vmem>>, vector<8x1xi32>
    %c0_10 = arith.constant 0 : index
    %c0_11 = arith.constant 0 : index
    %10 = vector.load %arg7[%c0_10, %c0_11] : memref<1x128xf32, #tpu.memory_space<vmem>>, vector<1x128xf32>
    %c0_12 = arith.constant 0 : index
    %c0_13 = arith.constant 0 : index
    %11 = vector.load %arg6[%c0_12, %c0_13] : memref<128x128xf32, #tpu.memory_space<vmem>>, vector<128x128xf32>
    %c8_i32 = arith.constant 8 : i32
    %12 = arith.muli %arg1, %c8_i32 : i32
    %c0_i32_14 = arith.constant 0 : i32
    %13 = arith.cmpi eq, %arg1, %c0_i32_14 : i32
    %c1_i32 = arith.constant 1 : i32
    %c0_i32_15 = arith.constant 0 : i32
    %14 = arith.select %13, %c1_i32, %c0_i32_15 : i32
    %15 = arith.index_cast %arg0 : i32 to index
    %16 = memref.load %arg2[%15] : memref<1xi32, #tpu.memory_space<smem>>
    %17 = arith.subi %16, %12 : i32
    %c0_i32_16 = arith.constant 0 : i32
    %c8_i32_17 = arith.constant 8 : i32
    %18 = arith.maxsi %c0_i32_16, %17 : i32
    %19 = arith.minsi %c8_i32_17, %18 : i32
    %c0_18 = arith.constant 0 : index
    %c0_19 = arith.constant 0 : index
    %20 = vector.load %arg12[%c0_18, %c0_19] : memref<8x128xf32, #tpu.memory_space<vmem>>, vector<8x128xf32>
    %cst_20 = arith.constant dense<0xFF800000> : vector<8xf32>
    %21 = vector.multi_reduction <maximumf>, %20, %cst_20 [1] : vector<8x128xf32> to vector<8xf32>
    %22 = vector.shape_cast %21 : vector<8xf32> to vector<8x1xf32>
    %23 = arith.subi %19, %14 : i32
    %24 = arith.addi %14, %23 : i32
    %c1_i32_21 = arith.constant 1 : i32
    %25:2 = scf.for %arg13 = %14 to %24 step %c1_i32_21 iter_args(%arg14 = %20, %arg15 = %22) -> (vector<8x128xf32>, vector<8x1xf32>)  : i32 {
      %30 = vector.broadcast %arg15 : vector<8x1xf32> to vector<8x128xf32>
      %31 = arith.subf %arg14, %30 : vector<8x128xf32>
      %32 = math.exp %31 : vector<8x128xf32>
      %cst_26 = arith.constant dense<0.000000e+00> : vector<8x128xf32>
      %33 = tpu.matmul %32, %11, %cst_26 {dimension_numbers = #tpu.dot_dimension_numbers<[1], [0], [0], [1], [0, 0, 1, 1], [], []>} : vector<8x128xf32>, vector<128x128xf32>, vector<8x128xf32> -> vector<8x128xf32>
      %cst_27 = arith.constant 0.000000e+00 : f32
      %34 = vector.broadcast %cst_27 : f32 to vector<8x128xf32>
      %35 = arith.cmpf ogt, %33, %34 : vector<8x128xf32>
      %cst_28 = arith.constant 9.99999991E-38 : f32
      %36 = vector.broadcast %cst_28 : f32 to vector<8x128xf32>
      %37 = arith.maximumf %33, %36 : vector<8x128xf32>
      %38 = math.log %37 : vector<8x128xf32>
      %39 = vector.broadcast %10 : vector<1x128xf32> to vector<8x128xf32>
      %40 = arith.addf %38, %39 : vector<8x128xf32>
      %cst_29 = arith.constant -1.000000e+30 : f32
      %41 = vector.broadcast %cst_29 : f32 to vector<8x128xf32>
      %42 = arith.select %35, %40, %41 : vector<8x128xi1>, vector<8x128xf32>
      %43 = arith.index_cast %arg13 : i32 to index
      %c0_30 = arith.constant 0 : index
      %c0_31 = arith.constant 0 : index
      %44 = vector.load %arg11[%43, %c0_30, %c0_31] : memref<8x8x128xf32, #tpu.memory_space<vmem>>, vector<1x8x128xf32>
      %45 = vector.shape_cast %44 : vector<1x8x128xf32> to vector<8x128xf32>
      %46 = vector.broadcast %arg15 : vector<8x1xf32> to vector<8x128xf32>
      %47 = arith.addf %45, %46 : vector<8x128xf32>
      %48 = arith.addf %47, %42 : vector<8x128xf32>
      %cst_32 = arith.constant dense<0xFF800000> : vector<8xf32>
      %49 = vector.multi_reduction <maximumf>, %48, %cst_32 [1] : vector<8x128xf32> to vector<8xf32>
      %50 = vector.shape_cast %49 : vector<8xf32> to vector<8x1xf32>
      %cst_33 = arith.constant 1.000000e+01 : f32
      %51 = vector.broadcast %cst_33 : f32 to vector<8x1xf32>
      %52 = arith.subf %50, %51 : vector<8x1xf32>
      %53 = vector.broadcast %52 : vector<8x1xf32> to vector<8x128xf32>
      %54 = arith.cmpf oge, %48, %53 : vector<8x128xf32>
      %cst_34 = arith.constant -1.000000e+30 : f32
      %55 = vector.broadcast %cst_34 : f32 to vector<8x128xf32>
      %56 = arith.select %54, %48, %55 : vector<8x128xi1>, vector<8x128xf32>
      %57 = arith.addi %12, %arg13 : i32
      %58 = vector.broadcast %57 : i32 to vector<8x1xi32>
      %59 = arith.cmpi slt, %58, %9 : vector<8x1xi32>
      %60 = vector.shape_cast %59 : vector<8x1xi1> to vector<8x1xi1>
      %61 = vector.broadcast %60 : vector<8x1xi1> to vector<8x128xi1>
      %62 = arith.select %61, %56, %arg14 : vector<8x128xi1>, vector<8x128xf32>
      %63 = arith.select %59, %50, %arg15 : vector<8x1xi1>, vector<8x1xf32>
      scf.yield %62, %63 : vector<8x128xf32>, vector<8x1xf32>
    }
    %c0_22 = arith.constant 0 : index
    %c0_23 = arith.constant 0 : index
    %26 = vector.load %arg12[%c0_22, %c0_23] : memref<8x128xf32, #tpu.memory_space<vmem>>, vector<8x128xf32>
    tpu.vector_store %arg12[%c0_22, %c0_23], %25#0 {strides = array<i32>} : memref<8x128xf32, #tpu.memory_space<vmem>>, vector<8x128xf32>,
    %c0_i32_24 = arith.constant 0 : i32
    %27 = arith.cmpi eq, %arg1, %c0_i32_24 : i32
    %28 = arith.extui %27 : i1 to i32
    %c0_i32_25 = arith.constant 0 : i32
    %29 = arith.cmpi ne, %28, %c0_i32_25 : i32
    scf.if %29 {
      %c0_26 = arith.constant 0 : index
      %c0_27 = arith.constant 0 : index
      %30 = vector.load %arg12[%c0_26, %c0_27] : memref<8x128xf32, #tpu.memory_space<vmem>>, vector<8x128xf32>
      %c0_28 = arith.constant 0 : index
      %c0_29 = arith.constant 0 : index
      %31 = vector.load %arg9[%c0_28, %c0_29] : memref<1x128xf32, #tpu.memory_space<vmem>>, vector<1x128xf32>
      %32 = vector.broadcast %31 : vector<1x128xf32> to vector<8x128xf32>
      %33 = arith.addf %30, %32 : vector<8x128xf32>
      %cst_30 = arith.constant dense<0xFF800000> : vector<8xf32>
      %34 = vector.multi_reduction <maximumf>, %33, %cst_30 [1] : vector<8x128xf32> to vector<8xf32>
      %35 = vector.shape_cast %34 : vector<8xf32> to vector<8x1xf32>
      %36 = vector.broadcast %35 : vector<8x1xf32> to vector<8x128xf32>
      %37 = arith.subf %33, %36 : vector<8x128xf32>
      %38 = math.exp %37 : vector<8x128xf32>
      %cst_31 = arith.constant dense<0.000000e+00> : vector<8xf32>
      %39 = vector.multi_reduction <add>, %38, %cst_31 [1] : vector<8x128xf32> to vector<8xf32>
      %40 = vector.shape_cast %39 : vector<8xf32> to vector<8x1xf32>
      %41 = math.log %40 : vector<8x1xf32>
      %42 = arith.addf %35, %41 : vector<8x1xf32>
      %c0_32 = arith.constant 0 : index
      %c0_33 = arith.constant 0 : index
      %43 = vector.load %arg10[%c0_32, %c0_33] : memref<8x1xf32, #tpu.memory_space<vmem>>, vector<8x1xf32>
      tpu.vector_store %arg10[%c0_32, %c0_33], %42 {strides = array<i32>} : memref<8x1xf32, #tpu.memory_space<vmem>>, vector<8x1xf32>,
    } else {
    }
    return
  }
  func.func @transform_0(%arg0: i32, %arg1: i32, %arg2: memref<1xi32, #tpu.memory_space<smem>>) -> (i32, i32, i32) {
    %c0_i32 = arith.constant 0 : i32
    %c0_i32_0 = arith.constant 0 : i32
    return %arg1, %arg0, %c0_i32 : i32, i32, i32
  }
  func.func @transform_1(%arg0: i32, %arg1: i32, %arg2: memref<1xi32, #tpu.memory_space<smem>>) -> (i32, i32) {
    %c0_i32 = arith.constant 0 : i32
    %c0_i32_0 = arith.constant 0 : i32
    return %arg0, %c0_i32 : i32, i32
  }
  func.func @transform_2(%arg0: i32, %arg1: i32, %arg2: memref<1xi32, #tpu.memory_space<smem>>) -> (i32, i32) {
    %c0_i32 = arith.constant 0 : i32
    %c0_i32_0 = arith.constant 0 : i32
    %c0_i32_1 = arith.constant 0 : i32
    return %c0_i32, %c0_i32_0 : i32, i32
  }
  func.func @transform_3(%arg0: i32, %arg1: i32, %arg2: memref<1xi32, #tpu.memory_space<smem>>) -> (i32, i32) {
    %c0_i32 = arith.constant 0 : i32
    %c0_i32_0 = arith.constant 0 : i32
    %c0_i32_1 = arith.constant 0 : i32
    return %c0_i32, %c0_i32_0 : i32, i32
  }
  func.func @transform_4(%arg0: i32, %arg1: i32, %arg2: memref<1xi32, #tpu.memory_space<smem>>) -> (i32, i32) {
    %c0_i32 = arith.constant 0 : i32
    %c0_i32_0 = arith.constant 0 : i32
    %c0_i32_1 = arith.constant 0 : i32
    return %c0_i32, %c0_i32_0 : i32, i32
  }
  func.func @transform_5(%arg0: i32, %arg1: i32, %arg2: memref<1xi32, #tpu.memory_space<smem>>) -> (i32, i32) {
    %c0_i32 = arith.constant 0 : i32
    %c0_i32_0 = arith.constant 0 : i32
    %c0_i32_1 = arith.constant 0 : i32
    return %c0_i32, %c0_i32_0 : i32, i32
  }
  func.func @transform_6(%arg0: i32, %arg1: i32, %arg2: memref<1xi32, #tpu.memory_space<smem>>) -> (i32, i32) {
    %c0_i32 = arith.constant 0 : i32
    %c0_i32_0 = arith.constant 0 : i32
    %c0_i32_1 = arith.constant 0 : i32
    return %c0_i32, %c0_i32_0 : i32, i32
  }
  func.func @transform_7(%arg0: i32, %arg1: i32, %arg2: memref<1xi32, #tpu.memory_space<smem>>) -> (i32, i32) {
    %c0_i32 = arith.constant 0 : i32
    %c0_i32_0 = arith.constant 0 : i32
    return %arg0, %c0_i32 : i32, i32
  }
}

</mosaic_0001>

<bundles_post_ra>
// kernel: tpu_custom_call.1
= control target key start
LH: loop header
LB: loop body
LE: loop exit
PB: predicated region body
PF: predicated region fallthrough
CT: control target
= control target key end

     0   :  { %14 = vsyncpa [#allocation7], 0  ;;  %s882_s0 = inlined_call_operand.<no memory space> [shape: s32[1], index: 0, kind: input, shape index: {}]   ;;  %s883_s1 = inlined_call_operand.hbm [shape: f32[8,8,16], index: 1, kind: input, shape index: {}]   ;;  %s884_s2 = inlined_call_operand.vmem [shape: s32[8,1], index: 2, kind: input, shape index: {}]   ;;  %s885_s3 = inlined_call_operand.vmem [shape: f32[16,128], index: 3, kind: input, shape index: {}]   ;;  %s886_s4 = inlined_call_operand.hbm [shape: f32[128,128], index: 4, kind: input, shape index: {}]   ;;  %s887_s5 = inlined_call_operand.vmem [shape: f32[1,128], index: 5, kind: input, shape index: {}]   ;;  %s888_s6 = inlined_call_operand.vmem [shape: f32[1,128], index: 6, kind: input, shape index: {}]   ;;  %s889_s7 = inlined_call_operand.vmem [shape: f32[1,128], index: 7, kind: input, shape index: {}]   ;;  %s890_s8 = inlined_call_operand.vmem [shape: f32[8,1], index: 8, kind: output, shape index: {}]  }
   0x1   :  { %15 = vsyncpa [#allocation9], 0  ;;  %s668_s27 = smov [#allocation6]   ;;  %s588_s9 = scalar_lea.hbm %s883_s1, 1024 }
   0x2   :  { %s21_s28 = sshll.u32 %s668_s27, 4  ;;  %p589_p0 = scmp.ne.s32.totalorder %s883_s1, %s588_s9  ;;  %s22_s28 = int_to_ptr.vmem [resolvable:$true] %s21_s28 }
   0x3   :  { %p592_p1 = scmp.lt.u32.totalorder %s588_s9, %s883_s1 }
   0x5   :  { %p594_p2 = pnand %p592_p1, %p589_p0 }
   0x7   :  { %597 = shalt.err (!%p594_p2)
}
   0x8   :  { %s598_s14 = scalar_lea.vmem %s22_s28, 1024  ;;  %p603_p4 = scmp.lt.s32.totalorder %s22_s28, %s22_s28 }
   0x9   :  { %p599_p3 = scmp.ne.s32.totalorder %s22_s28, %s598_s14  ;;  %p604_p5 = scmp.lt.s32.totalorder %s598_s14, %s598_s14 }
   0xb   :  { %p605_p6 = por %p604_p5, %p603_p4 }
   0xd   :  { %p606_p7 = pnand %p605_p6, %p599_p3 }
   0xf   :  { %609 = shalt.err (!%p606_p7)
}
  0x10   :  { %s669_s15 = smov 128   ;;  %s670_s16 = smov 8  }
  0x11   :  { %27 = dma.hbm_to_vmem [thread:$0]  %s883_s1, 1024, %s22_s28, [#allocation7], %s669_s15, %s669_s15, %s670_s16  }
  0x12   :  { %s671_s19 = smov [#allocation8]   ;;  %s610_s23 = scalar_lea.hbm %s886_s4, 2048 }
  0x13   :  { %s37_s20 = sshll.u32 %s671_s19, 4  ;;  %p611_p8 = scmp.ne.s32.totalorder %s886_s4, %s610_s23  ;;  %s38_s20 = int_to_ptr.vmem [resolvable:$true] %s37_s20 }
  0x14   :  { %p614_p9 = scmp.lt.u32.totalorder %s610_s23, %s886_s4 }
  0x16   :  { %p616_p10 = pnand %p614_p9, %p611_p8 }
  0x18   :  { %619 = shalt.err (!%p616_p10)
}
  0x19   :  { %s620_s29 = scalar_lea.vmem %s38_s20, 2048  ;;  %p625_p12 = scmp.lt.s32.totalorder %s38_s20, %s38_s20 }
  0x1a   :  { %p621_p11 = scmp.ne.s32.totalorder %s38_s20, %s620_s29  ;;  %p626_p13 = scmp.lt.s32.totalorder %s620_s29, %s620_s29 }
  0x1c   :  { %p627_p0 = por %p626_p13, %p625_p12 }
  0x1e   :  { %p628_p1 = pnand %p627_p0, %p621_p11 }
  0x20   :  { %631 = shalt.err (!%p628_p1)
}
  0x21   :  { %43 = dma.hbm_to_vmem [thread:$0]  %s886_s4, 2048, %s38_s20, [#allocation9], %s669_s15, %s669_s15, %s670_s16  }
  0x22   :  { %648 = dma.done.wait [#allocation7], 1024  }
  0x23   :  { %649 = vsyncadd [#allocation7], 4294966272 }
  0x24   :  { %650 = dma.done.wait [#allocation9], 2048  }
  0x25   :  { %651 = vsyncadd [#allocation9], 4294965248  ;;  %v748_v0 = vld [vmem:[%s884_s2] sm:$0xff]  ;;  %v757_v3 = vld [vmem:[#allocation8 + $0x8] sm:$0xff]  ;;  %vm66_vm0 = vcmask 130048   ;;  %p240_p2 = scmp.gt.s32.totalorder %s882_s0, 0 }
  0x26   :  { %v753_v1 = vld [vmem:[%s887_s5] ss:$0 sm:$0xff]  ;;  %v759_v4 = vld [vmem:[#allocation8 + $0x10] sm:$0xff]  ;;  %v761_v5 = vld [vmem:[#allocation8 + $0x18] sm:$0xff]  ;;  %p418_p3 = scmp.lt.s32.totalorder %s882_s0, 8 }
  0x27   :  { %v755_v2 = vld [vmem:[#allocation8] sm:$0xff]  ;;  %v765_v7 = vld [vmem:[#allocation8 + $0x28] sm:$0xff]  ;;  %v767_v8 = vld [vmem:[#allocation8 + $0x30] sm:$0xff]  ;;  %s897_s0 = smov (!%p240_p2, %s882_s0), 0 }
  0x28   :  { %v763_v6 = vld [vmem:[#allocation8 + $0x20] sm:$0xff]  ;;  %v769_v9 = vld [vmem:[#allocation8 + $0x38] sm:$0xff]  ;;  %v773_v11 = vld [vmem:[#allocation8 + $0x48] sm:$0xff]  ;;  %s899_s0 = smov (!%p418_p3, %s897_s0), 8 }
  0x29   :  { %v771_v10 = vld [vmem:[#allocation8 + $0x40] sm:$0xff]  ;;  %v775_v12 = vld [vmem:[#allocation8 + $0x50] sm:$0xff]  ;;  %v777_v13 = vld [vmem:[#allocation8 + $0x58] sm:$0xff]  ;;  %p423_p4 = scmp.le.s32.totalorder %s899_s0, 1 }
  0x2a   :  { %v779_v14 = vld [vmem:[#allocation8 + $0x60] sm:$0xff]  ;;  %v781_v15 = vld [vmem:[#allocation8 + $0x68] sm:$0xff]  ;;  %v783_v16 = vld [vmem:[#allocation8 + $0x70] sm:$0xff] }
  0x2b   :  { %v785_v17 = vld [vmem:[#allocation8 + $0x78] sm:$0xff]  ;;  %v64_v18 = vld [vmem:[%s885_s3] sm:$0xff]  ;;  %v65_v19 = vld [vmem:[%s885_s3 + $0x8] sm:$0xff] }
  0x2c   :  { %v56_v20 = vld [vmem:[#allocation6] sm:$0xff]  ;;  %v508_v21 = vpack.c.bf16 %v65_v19, %v64_v18  ;;  %v57_v23 = vld [vmem:[#allocation6 + $0x8] sm:$0xff]  ;;  %v58_v25 = vld [vmem:[#allocation6 + $0x10] sm:$0xff] }
  0x2d   :  { %461 = vmatprep.mubr.msk.f32.mxu0 %vm66_vm0, %v56_v20  ;;  %v60_v22 = vld [vmem:[#allocation6 + $0x20] sm:$0xff]  ;;  %v61_v24 = vld [vmem:[#allocation6 + $0x28] sm:$0xff]  ;;  %v62_v26 = vld [vmem:[#allocation6 + $0x30] sm:$0xff] }
  0x2e   :  { %467 = vmatprep.mubr.msk.f32.mxu1 %vm66_vm0, %v60_v22  ;;  %509 = vmatprep.subr.bf16.mxu0 %v508_v21  ;;  %v59_v27 = vld [vmem:[#allocation6 + $0x18] sm:$0xff]  ;;  %v417_v29 = vld [vmem:[%s888_s6] ss:$0 sm:$0xff]  ;;  %s822_s6 = smov (!%p423_p4), 1  }
  0x2f   :  { %536 = vmatprep.subr.bf16.mxu1 %v508_v21  ;;  %511 = vmatpush3.bf16.msra.mxu0 %v508_v21  ;;  %v63_v28 = vld [vmem:[#allocation6 + $0x38] sm:$0xff] }
  0x30   :  { %537 = vmatpush3.bf16.msra.mxu1 %v508_v21 }
  0x32   :  { %462 = vmatmul.mubr.msk.f32.vlgmr.msra.gmra.mrb[0].mxu0 %vm66_vm0, %v57_v23 }
  0x33   :  { %468 = vmatmul.mubr.msk.f32.vlgmr.msra.gmra.mrb[0].mxu1 %vm66_vm0, %v61_v24  ;;  %464 = vmatprep.mubr.msk.f32.mxu0 %vm66_vm0, %v58_v25 }
  0x34   :  { %470 = vmatprep.mubr.msk.f32.mxu1 %vm66_vm0, %v62_v26 }
  0x36   :  { %465 = vmatmul.mubr.msk.f32.gmra.mrb[2].mxu0 %vm66_vm0, %v59_v27 }
  0x37   :  { %471 = vmatmul.mubr.msk.f32.gmra.mrb[2].mxu1 %vm66_vm0, %v63_v28 }
 0x105   :  { %v463_v30 = vpop.f32.mrb[0].mxu0 }
 0x106   :  { %v469_v31 = vpop.f32.mrb[0].mxu1  ;;  %197 = vst [vmem:[#allocation2 + $0x8] sm:$0xff] %v463_v30  ;;  %v157_v32 = vpop.f32.mrb[1].mxu0 }
 0x107   :  { %201 = vst [vmem:[#allocation2 + $0x28] sm:$0xff] %v469_v31  ;;  %v177_v33 = vpop.f32.mrb[1].mxu1  ;;  %196 = vst [vmem:[#allocation2] sm:$0xff] %v157_v32  ;;  %v216_v34 = vadd.f32 %v417_v29, %v157_v32  }
 0x108   :  { %200 = vst [vmem:[#allocation2 + $0x20] sm:$0xff] %v177_v33 }
 0x109   :  { %245 = vmax.xlane.f32.xlu0 %v216_v34  ;;  %v466_v35 = vpop.f32.mrb[2].mxu0  ;;  %v891_v40 = vmov %v216_v34 }
 0x10a   :  { %v472_v36 = vpop.f32.mrb[2].mxu1  ;;  %199 = vst [vmem:[#allocation2 + $0x18] sm:$0xff] %v466_v35  ;;  %v167_v37 = vpop.f32.mrb[3].mxu0 }
 0x10b   :  { %203 = vst [vmem:[#allocation2 + $0x38] sm:$0xff] %v472_v36  ;;  %v187_v38 = vpop.f32.mrb[3].mxu1  ;;  %198 = vst [vmem:[#allocation2 + $0x10] sm:$0xff] %v167_v37 }
 0x10c   :  { %202 = vst [vmem:[#allocation2 + $0x30] sm:$0xff] %v187_v38 }
 0x190   :  { %402 = sbr.rel (%p423_p4) target bundleno = 932 (0x3a4), region = 66 }
 0x196   :  { %v246_v39 = vpop.xlane.xlu0 %245  }
 0x197 LB: > { %v513_v41 = vpack.c.bf16 %v757_v3, %v755_v2  ;;  %v672_v42 = vmov 0   ;;  %v673_v43 = vmov 0.0|0.0   ;;  %v516_v44 = vpack.c.bf16 %v761_v5, %v759_v4  ;;  %s425_s20 = sshll.u32 %s662_s6, 3  ;;  %s662_s6 = sphi %s822_s6, %s250_s6   ;;  %v658_v34 = vphi %v216_v34, %v894_v34   ;;  %v654_v39 = vphi %v246_v39, %v364_v39  }
 0x198   : > { %578 = vset.pattern.permute.xlu0 %v672_v42  ;;  %512 = vmatprep.subr.bf16.mxu0 %v673_v43  ;;  %v519_v45 = vpack.c.bf16 %v765_v7, %v763_v6  ;;  %vm674_vm1 = vmmov 0   ;;  %v675_v46 = vmov 0.0   ;;  %v522_v47 = vpack.c.bf16 %v769_v9, %v767_v8  ;;  %s346_s21 = scalar_lea.vmem [#allocation2], %s425_s20 }
 0x199   : > { %257 = vperm.xlu0 %578, %v654_v39   ;;  %514 = vmatpush3.bf16.msra.mxu0 %v513_v41  ;;  %v525_v48 = vpack.c.bf16 %v773_v11, %v771_v10  ;;  %v528_v49 = vpack.c.bf16 %v777_v13, %v775_v12  ;;  %v531_v50 = vpack.c.bf16 %v781_v15, %v779_v14  ;;  %v356_v56 = vstv %s662_s6  ;;  %v347_v63 = vld [vmem:[%s346_s21] sm:$0xff]  ;;  %s250_s6 = sadd.s32 1, %s662_s6  }
 0x19a   : > { %515 = vmatprep.subr.bf16.mxu0 %v673_v43  ;;  %579 = vset.pattern.permute.xlu1 %v672_v42  ;;  %v534_v51 = vpack.c.bf16 %v785_v17, %v783_v16  ;;  %vm853_vm2 = vcmp.lt.s32.totalorder %v356_v56, %v748_v0  ;;  %p249_p5 = scmp.ge.s32.totalorder %s250_s6, %s899_s0 }
 0x19b   : > { %505 = vmatprep.mubr.msk.f32.mxu0 %vm674_vm1, %v675_v46  ;;  %v358_v58 = vsel %vm853_vm2, 1, %v672_v42 }
 0x19c   : > { %360 = vperm.xlu1 %579, %v358_v58  }
 0x19d   : > { %517 = vmatpush3.bf16.msra.mxu0 %v516_v44 }
 0x19e   : > { %518 = vmatprep.subr.bf16.mxu0 %v673_v43 }
 0x1a1   : > { %520 = vmatpush3.bf16.msra.mxu0 %v519_v45 }
 0x1a2   : > { %521 = vmatprep.subr.bf16.mxu0 %v673_v43 }
 0x1a5   : > { %523 = vmatpush3.bf16.msra.mxu0 %v522_v47 }
 0x1a6   : > { %524 = vmatprep.subr.bf16.mxu0 %v673_v43 }
 0x1a9   : > { %526 = vmatpush3.bf16.msra.mxu0 %v525_v48 }
 0x1aa   : > { %527 = vmatprep.subr.bf16.mxu0 %v673_v43 }
 0x1ad   : > { %529 = vmatpush3.bf16.msra.mxu0 %v528_v49 }
 0x1ae   : > { %530 = vmatprep.subr.bf16.mxu0 %v673_v43 }
 0x1b1   : > { %532 = vmatpush3.bf16.msra.mxu0 %v531_v50 }
 0x1b2   : > { %533 = vmatprep.subr.bf16.mxu0 %v673_v43 }
 0x1b5   : > { %535 = vmatpush3.bf16.msra.mxu0 %v534_v51 }
 0x218   : > { %v258_v52 = vpop.permute.xlu0 %257 }
 0x219   : > { %v260_v53 = vsub.f32 %v658_v34, %v258_v52  ;;  %v348_v20 = vadd.f32 %v347_v63, %v258_v52 }
 0x21b   : > { %v261_v54 = vmul.f32 1.442695, %v260_v53  ;;  %v361_v23 = vpop.permute.xlu1 %360 }
 0x21c   : > { %vm362_vm4 = vcmp.eq.s32.totalorder %v361_v23, 1 }
 0x21d   : > { %580 = vpow2.f32 %v261_v54 }
 0x227   : > { %v581_v55 = vpop.eup %580 }
 0x228   : > { %506 = vmatmul.mubr.f32.vlgmr.msra.gmra.mrb[0].mxu0 %v581_v55 }
 0x2fb   : > { %v329_v59 = vpop.f32.mrb[0].mxu0 }
 0x2fc   : > { %v334_v60 = vmax.f32 %v329_v59, 1e-37  ;;  %v507_v61 = vpop.f32.mrb[1].mxu0  ;;  %vm333_vm3 = vcmp.gt.f32.partialorder %v329_v59, 0.0 }
 0x2fe   : > { %582 = vlog2.f32 %v334_v60 }
 0x308   : > { %v583_v62 = vpop.eup %582 }
 0x309   : > { %v336_v18 = vmul.f32 0.6931472, %v583_v62 }
 0x30b   : > { %v343_v19 = vadd.f32 %v753_v1, %v336_v18 }
 0x30d   : > { %v344_v21 = vsel %vm333_vm3, %v343_v19, -1e+30 }
 0x30e   : > { %v349_v22 = vadd.f32 %v348_v20, %v344_v21 }
 0x310   : > { %350 = vmax.xlane.f32.xlu0 %v349_v22 }
 0x39d   : > { %v351_v24 = vpop.xlane.xlu0 %350  ;;  %252 = sbr.rel (!%p249_p5) target bundleno = 407 (0x197), region = 72 }
 0x39e   : > { %v426_v25 = vadd.f32 -10.0, %v351_v24  ;;  %v364_v39 = vsel %vm853_vm2, %v351_v24, %v654_v39  }
 0x3a0   : > { %vm353_vm5 = vcmp.ge.f32.partialorder %v349_v22, %v426_v25 }
 0x3a1   : > { %v354_v26 = vsel %vm353_vm5, %v349_v22, -1e+30 }
 0x3a2   : > { %v363_v27 = vsel %vm362_vm4, %v354_v26, %v658_v34  }
 0x3a3   : > { %v894_v34 = vmov %v363_v27  ;;  %v895_v40 = vmov (%p249_p5), %v363_v27 }
 0x3a4 PF:  { %v427_v28 = vld [vmem:[%s889_s7] ss:$0 sm:$0xff]  ;;  %vm388_vm6 = vcmask 7168   ;;  %v666_v40 = vphi %v891_v40, %v895_v40  }
 0x3a5   :  { %v377_v29 = vadd.f32 %v666_v40, %v427_v28 }
 0x3a7   :  { %378 = vmax.xlane.f32.xlu0 %v377_v29 }
 0x434   :  { %v379_v30 = vpop.xlane.xlu0 %378 }
 0x435   :  { %v380_v31 = vsub.f32 %v377_v29, %v379_v30 }
 0x437   :  { %v381_v32 = vmul.f32 1.442695, %v380_v31 }
 0x439   :  { %584 = vpow2.f32 %v381_v32 }
 0x443   :  { %v585_v33 = vpop.eup %584 }
 0x444   :  { %383 = vadd.xlane.f32.xlu0 %v585_v33 }
 0x4d1   :  { %v384_v34 = vpop.xlane.xlu0 %383 }
 0x4d2   :  { %586 = vlog2.f32 %v384_v34 }
 0x4dc   :  { %v587_v0 = vpop.eup %586 }
 0x4dd   :  { %v386_v1 = vmul.f32 0.6931472, %v587_v0 }
 0x4df   :  { %v387_v2 = vadd.f32 %v386_v1, %v379_v30 }
 0x4e1   :  { %389 = vst.msk [vmem:[%s890_s8] sm:$0xff] %vm388_vm6, %v387_v2 }
 0x4e2   :  { %394 = vsyncpa [#allocation7], 1 }
 0x4e3   :  { %395 = vsyncpa [#allocation9], 1 }

</bundles_post_ra>
